<compile_context>
chip_gen: v5e
topology: v5e:2x2
jax: 0.10.0
libtpu: 0.0.40
codegen_flags: <defaults>
</compile_context>

<pallas_src>
import functools

import jax
import jax.numpy as jnp
from jax.experimental import pallas as pl
from jax.experimental.pallas import tpu as pltpu


def _linear_kernel(w_sref, xt_ref, yt_ref):
    # w_sref: (2, 3) f32 weights in SMEM (scalar-prefetched once before the grid).
    # xt_ref: (3, TB) bf16 tile — batch on the 128-wide lane axis (lane-dense DMA).
    # yt_ref: (2, TB) bf16 tile — batch on the lane axis (lane-dense store).
    # Hoist the 6 SMEM scalar reads out of the vector math.
    w00 = w_sref[0, 0]
    w01 = w_sref[0, 1]
    w02 = w_sref[0, 2]
    w10 = w_sref[1, 0]
    w11 = w_sref[1, 1]
    w12 = w_sref[1, 2]

    x = xt_ref[...].astype(jnp.float32)   # f32 VPU math (v5e has no bf16 VALU)
    x0 = x[0:1, :]
    x1 = x[1:2, :]
    x2 = x[2:3, :]

    # y[o, :] = w[o,0]*x0 + w[o,1]*x1 + w[o,2]*x2 : 6 FMAs/lane on the VPU.
    # MXU would be >99.9% padding for K=3, O=2.
    y0 = w00 * x0 + w01 * x1 + w02 * x2
    y1 = w10 * x0 + w11 * x1 + w12 * x2
    # Single full-block store: rows 0/1 form exactly one packed bf16 sublane,
    # so this lowers to plain (unmasked within the block) stores.
    yt_ref[...] = jnp.concatenate([y0, y1], axis=0).astype(yt_ref.dtype)


def _round_up(a, m):
    return ((a + m - 1) // m) * m


@functools.partial(jax.jit, static_argnames=("tb", "min_pallas_batch"))
def linear_forward(x, w, *, tb=65536, min_pallas_batch=1024):
    """y = x @ w.T (nn.Linear weight convention, no bias) via a Pallas kernel.

    x: (B, in_features=3) bf16
    w: (out_features=2, in_features=3) bf16
    returns: (B, out_features) bf16
    """
    B, K = x.shape
    O, K2 = w.shape
    assert K == K2

    if B < min_pallas_batch:
        # Tiny batches: one fused XLA dot beats transpose + pallas_call + transpose.
        return (x.astype(jnp.float32) @ w.astype(jnp.float32).T).astype(x.dtype)

    # ---- batch-lane tile selection ----------------------------------------
    # Lane tiles must be a multiple of 128 regardless of the caller-supplied tb.
    tb = max(128, _round_up(int(tb), 128))
    # Keep >= 4 grid steps when the batch allows it: v7x shards "parallel" grid
    # axes across its 2 TensorCores, and a longer grid pipelines better.
    if B >= 4 * 128:
        tb = min(tb, _round_up(pl.cdiv(B, 4), 128))
    TB = min(tb, _round_up(B, 128))
    num_tiles = pl.cdiv(B, TB)   # partial edge block is masked by Pallas (no pad/slice)

    # Lane-dense layout for the kernel: batch on the 128-wide lane axis.
    # TODO(synk): folding this transpose into the kernel needs a stride-3 lane
    # gather (not a rectangular DMA), so it is left to XLA's transpose.
    xt = x.T                          # (K, B)
    w_f32 = w.astype(jnp.float32)     # 6 scalars, prefetched into SMEM

    itemsize = jnp.dtype(x.dtype).itemsize
    cost = pl.CostEstimate(
        flops=2 * B * K * O,
        transcendentals=0,
        bytes_accessed=B * K * itemsize + O * K * 4 + B * O * itemsize,
    )

    yt = pl.pallas_call(
        _linear_kernel,
        out_shape=jax.ShapeDtypeStruct((O, B), x.dtype),
        grid_spec=pltpu.PrefetchScalarGridSpec(
            num_scalar_prefetch=1,    # w_f32 lands in SMEM before the grid runs
            grid=(num_tiles,),
            in_specs=[
                # (K, TB): sublane dim equals the full array dim K, lane dim is
                # a multiple of 128 -> satisfies the (8, 128) tiling rule.
                pl.BlockSpec((K, TB), lambda i, w_ref: (0, i)),
            ],
            out_specs=pl.BlockSpec((O, TB), lambda i, w_ref: (0, i)),
        ),
        compiler_params=pltpu.CompilerParams(
            # Batch tiles are independent: shard across TensorCores on v7x.
            dimension_semantics=("parallel",),
            # ~8 MiB double-buffered at TB=64K (bf16 sublane-padded); safe on
            # v7x's 64 MiB physical VMEM and within v5e's defaults.
            vmem_limit_bytes=32 * 1024 * 1024,
        ),
        cost_estimate=cost,
    )(w_f32, xt)

    return yt.T                       # (B, O)


def make_weight():
    # Mirrors: torch.rand(2, 3, dtype=torch.bfloat16); w[0, 0] = inf
    key = jax.random.PRNGKey(42)
    w = jax.random.uniform(key, (2, 3), dtype=jnp.float32).astype(jnp.bfloat16)
    w = w.at[0, 0].set(jnp.inf)
    return w


def _reference(x, w):
    return (x.astype(jnp.float32) @ w.astype(jnp.float32).T).astype(x.dtype)


def _check(y, x, w):
    y_ref = _reference(x, w)
    y32 = y.astype(jnp.float32)
    r32 = y_ref.astype(jnp.float32)
    finite = jnp.isfinite(r32)
    # Non-finite entries must match exactly (+inf vs -inf vs NaN), not just pattern.
    same_nonfinite = (y32 == r32) | (jnp.isnan(y32) & jnp.isnan(r32))
    assert bool(jnp.all(jnp.where(finite, True, same_nonfinite))), "non-finite mismatch"
    assert bool(
        jnp.allclose(
            jnp.where(finite, y32, 0.0),
            jnp.where(finite, r32, 0.0),
            atol=1e-2, rtol=1e-2,
        )
    ), "finite-value mismatch"


if __name__ == "__main__":
    w = make_weight()

    # Small-shape test (forces the Pallas path; single masked block).
    key = jax.random.PRNGKey(0)
    x_small = jax.random.normal(key, (8, 3), dtype=jnp.float32).astype(jnp.bfloat16)
    y_small = jax.block_until_ready(linear_forward(x_small, w, min_pallas_batch=0))
    _check(y_small, x_small, w)

    # Multi-tile test with a partial edge block (default path, grid of 4 tiles).
    key2 = jax.random.PRNGKey(1)
    x_big = jax.random.normal(key2, (4100, 3), dtype=jnp.float32).astype(jnp.bfloat16)
    y_big = jax.block_until_ready(linear_forward(x_big, w))
    _check(y_big, x_big, w)

    print("KERNEL_OK")
</pallas_src>

<mosaic_0001>
module attributes {stable_mosaic.version = 11 : i64} {
  func.func @_linear_kernel(%arg0: i32, %arg1: memref<2x3xf32, #tpu.memory_space<smem>>, %arg2: memref<3x128xbf16, #tpu.memory_space<vmem>>, %arg3: memref<2x128xbf16, #tpu.memory_space<vmem>>) attributes {dimension_semantics = [#tpu.dimension_semantics<parallel>], iteration_bounds = array<i64: 1>, scalar_prefetch = 1 : i64, scratch_operands = 0 : i64, tpu.core_type = #tpu.core_type<tc>, window_params = [{transform_indices = @transform_0, window_bounds = array<i64: 3, 128>}, {transform_indices = @transform_1, window_bounds = array<i64: 2, 128>}]} {
    %c0 = arith.constant 0 : index
    %c0_0 = arith.constant 0 : index
    %0 = memref.load %arg1[%c0, %c0_0] : memref<2x3xf32, #tpu.memory_space<smem>>
    %c0_1 = arith.constant 0 : index
    %c1 = arith.constant 1 : index
    %1 = memref.load %arg1[%c0_1, %c1] : memref<2x3xf32, #tpu.memory_space<smem>>
    %c0_2 = arith.constant 0 : index
    %c2 = arith.constant 2 : index
    %2 = memref.load %arg1[%c0_2, %c2] : memref<2x3xf32, #tpu.memory_space<smem>>
    %c1_3 = arith.constant 1 : index
    %c0_4 = arith.constant 0 : index
    %3 = memref.load %arg1[%c1_3, %c0_4] : memref<2x3xf32, #tpu.memory_space<smem>>
    %c1_5 = arith.constant 1 : index
    %c1_6 = arith.constant 1 : index
    %4 = memref.load %arg1[%c1_5, %c1_6] : memref<2x3xf32, #tpu.memory_space<smem>>
    %c1_7 = arith.constant 1 : index
    %c2_8 = arith.constant 2 : index
    %5 = memref.load %arg1[%c1_7, %c2_8] : memref<2x3xf32, #tpu.memory_space<smem>>
    %c0_9 = arith.constant 0 : index
    %c0_10 = arith.constant 0 : index
    %6 = vector.load %arg2[%c0_9, %c0_10] : memref<3x128xbf16, #tpu.memory_space<vmem>>, vector<3x128xbf16>
    %7 = arith.extf %6 : vector<3x128xbf16> to vector<3x128xf32>
    %8 = vector.extract_strided_slice %7 {offsets = [0, 0], sizes = [1, 128], strides = [1, 1]} : vector<3x128xf32> to vector<1x128xf32>
    %9 = vector.extract_strided_slice %7 {offsets = [1, 0], sizes = [1, 128], strides = [1, 1]} : vector<3x128xf32> to vector<1x128xf32>
    %10 = vector.extract_strided_slice %7 {offsets = [2, 0], sizes = [1, 128], strides = [1, 1]} : vector<3x128xf32> to vector<1x128xf32>
    %11 = vector.broadcast %0 : f32 to vector<1x128xf32>
    %12 = arith.mulf %11, %8 : vector<1x128xf32>
    %13 = vector.broadcast %1 : f32 to vector<1x128xf32>
    %14 = arith.mulf %13, %9 : vector<1x128xf32>
    %15 = arith.addf %12, %14 : vector<1x128xf32>
    %16 = vector.broadcast %2 : f32 to vector<1x128xf32>
    %17 = arith.mulf %16, %10 : vector<1x128xf32>
    %18 = arith.addf %15, %17 : vector<1x128xf32>
    %19 = vector.broadcast %3 : f32 to vector<1x128xf32>
    %20 = arith.mulf %19, %8 : vector<1x128xf32>
    %21 = vector.broadcast %4 : f32 to vector<1x128xf32>
    %22 = arith.mulf %21, %9 : vector<1x128xf32>
    %23 = arith.addf %20, %22 : vector<1x128xf32>
    %24 = vector.broadcast %5 : f32 to vector<1x128xf32>
    %25 = arith.mulf %24, %10 : vector<1x128xf32>
    %26 = arith.addf %23, %25 : vector<1x128xf32>
    %27 = tpu.concatenate %18, %26 in 0 : vector<1x128xf32>, vector<1x128xf32> -> vector<2x128xf32>
    %28 = arith.truncf %27 : vector<2x128xf32> to vector<2x128xbf16>
    %c0_11 = arith.constant 0 : index
    %c0_12 = arith.constant 0 : index
    %29 = vector.load %arg3[%c0_11, %c0_12] : memref<2x128xbf16, #tpu.memory_space<vmem>>, vector<2x128xbf16>
    tpu.vector_store %arg3[%c0_11, %c0_12], %28 {strides = array<i32>} : memref<2x128xbf16, #tpu.memory_space<vmem>>, vector<2x128xbf16>,
    return
  }
  func.func @transform_0(%arg0: i32, %arg1: memref<2x3xf32, #tpu.memory_space<smem>>) -> (i32, i32) {
    %c0_i32 = arith.constant 0 : i32
    %c0_i32_0 = arith.constant 0 : i32
    return %c0_i32, %arg0 : i32, i32
  }
  func.func @transform_1(%arg0: i32, %arg1: memref<2x3xf32, #tpu.memory_space<smem>>) -> (i32, i32) {
    %c0_i32 = arith.constant 0 : i32
    %c0_i32_0 = arith.constant 0 : i32
    return %c0_i32, %arg0 : i32, i32
  }
}

</mosaic_0001>

<bundles_post_ra>
// kernel: linear_forward.1
= control target key start
LH: loop header
LB: loop body
LE: loop exit
PB: predicated region body
PF: predicated region fallthrough
CT: control target
= control target key end

     0   :  { %s132_s12 = smov [#allocation3]   ;;  %s158_s0 = inlined_call_operand.vmem [shape: f32[2,3], index: 0, kind: input, shape index: {}]   ;;  %s159_s1 = inlined_call_operand.vmem [shape: bf16[3,8], index: 1, kind: input, shape index: {}]   ;;  %s160_s2 = inlined_call_operand.hbm [shape: bf16[2,8], index: 2, kind: output, shape index: {}]  }
   0x1   :  { %s8_s11 = sshll.u32 %s158_s0, 4  ;;  %s9_s11 = int_to_ptr.vmem [resolvable:$true] %s8_s11 }
   0x2   :  { %11 = dma.vmem_to_smem %s9_s11, 32, %s132_s12, [#allocation2] }
   0x3   :  { %128 = dma.done.wait [#allocation2], 32 }
   0x4   :  { %129 = vsyncadd [#allocation2], 4294967264 }
   0x5   :  { %14 = sfence }
   0x6   :  { %s18_s13 = sld [smem:[#allocation3]] }
   0x7   :  { %s81_s14 = sld [smem:[#allocation3 + $0x1]] }
   0x8   :  { %15 = vsyncpa [#allocation5], 0  ;;  %s82_s15 = sld [smem:[#allocation3 + $0x2]]  ;;  %v24_v0 = vld [vmem:[%s159_s1] sm:$0x3]  ;;  %vm61_vm0 = vcmask 1040384  }
   0x9   :  { %s83_s16 = sld [smem:[#allocation3 + $0x80]]  ;;  %v25_v1 = vunpack.c.l.bf16 %v24_v0  ;;  %s133_s0 = smov [#allocation4]  }
   0xa   :  { %s84_s19 = sld [smem:[#allocation3 + $0x81]]  ;;  %s70_s1 = sshll.u32 %s133_s0, 4  ;;  %s71_s1 = int_to_ptr.vmem [resolvable:$true] %s70_s1 }
   0xb   :  { %s85_s20 = sld [smem:[#allocation3 + $0x82]]  ;;  %s72_s23 = sshll.u32 %s160_s2, 4  ;;  %s73_s23 = int_to_ptr.hbm [resolvable:$true] %s72_s23 }
   0xc   :  { %v26_v2 = vstv %s18_s13 }
   0xd   :  { %v28_v3 = vstv %s81_s14  ;;  %v27_v6 = vmul.f32 %v26_v2, %v25_v1 }
   0xe   :  { %v29_v4 = vmul.f32 %v28_v3, %v25_v1  ;;  %v35_v5 = vstv %s82_s15 }
   0xf   :  { %v36_v7 = vmul.f32 %v35_v5, %v25_v1  ;;  %v42_v8 = vstv %s83_s16 }
  0x10   :  { %v86_v9 = vrot.slane %v29_v4, 9  ;;  %v44_v10 = vstv %s84_s19  ;;  %v43_v11 = vmul.f32 %v42_v8, %v25_v1 }
  0x11   :  { %v45_v12 = vmul.f32 %v44_v10, %v25_v1  ;;  %v51_v13 = vstv %s85_s20  ;;  %v87_v16 = vrot.slane %v36_v7, 10 }
  0x12   :  { %v52_v14 = vmul.f32 %v51_v13, %v25_v1  ;;  %v34_v15 = vadd.f32 %v86_v9, %v27_v6 }
  0x13   :  { %v88_v17 = vrot.slane %v45_v12, 9 }
  0x14   :  { %v89_v18 = vrot.slane %v52_v14, 10  ;;  %v41_v20 = vadd.f32 %v87_v16, %v34_v15 }
  0x15   :  { %v50_v19 = vadd.f32 %v88_v17, %v43_v11 }
  0x17   :  { %v57_v21 = vadd.f32 %v89_v18, %v50_v19 }
  0x19   :  { %v59_v22 = vperm.slane %v57_v21, 0 }
  0x1b   :  { %v62_v23 = vsel %vm61_vm0, %v41_v20, %v59_v22 }
  0x1c   :  { %v63_v24 = vpack.c.bf16 %v62_v23, %v62_v23 }
  0x1e   :  { %64 = vst [vmem:[#allocation4] sm:$0x1] %v63_v24 }
  0x1f   :  { %75 = dma.vmem_to_hbm [thread:$0]  %s71_s1, 16, %s73_s23, [#allocation5]  }
  0x20   :  { %130 = dma.done.wait [#allocation5], 16  }
  0x21   :  { %131 = vsyncadd [#allocation5], 4294967280 }
  0x22   :  { %80 = vsyncpa [#allocation5], 1 }

</bundles_post_ra>
